<compile_context>
chip_gen: v7x
topology: tpu7x:2x2x1
jax: 0.10.0
libtpu: 0.0.40
codegen_flags: <defaults>
</compile_context>

<pallas_src>
import functools

import jax
import jax.numpy as jnp
from jax.experimental import pallas as pl
from jax.experimental.pallas import tpu as pltpu

HIDDEN = 256     # fc1/fc2 width (fixed by the PyTorch module)
LANE = 128       # TPU lane width
SUBLANE = 8      # TPU sublane width


def _round_up(x, m):
    return ((x + m - 1) // m) * m


def actor_kernel(x_ref, w1_ref, b1_ref, w2_ref, b2_ref, w3_ref, b3_ref, o_ref):
    """One batch tile: fused 3-layer MLP (relu, relu, tanh), all operands in VMEM."""
    w_dtype = w1_ref.dtype
    x = x_ref[...]

    h1 = jnp.dot(x, w1_ref[...], preferred_element_type=jnp.float32) + b1_ref[...]
    h1 = jnp.maximum(h1, 0.0).astype(w_dtype)

    h2 = jnp.dot(h1, w2_ref[...], preferred_element_type=jnp.float32) + b2_ref[...]
    h2 = jnp.maximum(h2, 0.0).astype(w_dtype)

    h3 = jnp.dot(h2, w3_ref[...], preferred_element_type=jnp.float32) + b3_ref[...]
    o_ref[...] = jnp.tanh(h3).astype(o_ref.dtype)


def _cost_estimate(b_rows, sd_pad, ad_pad, in_arrays):
    flops = 2 * b_rows * (sd_pad * HIDDEN + HIDDEN * HIDDEN + HIDDEN * ad_pad)
    bytes_in = sum(int(a.size) * a.dtype.itemsize for a in in_arrays)
    bytes_out = b_rows * ad_pad * 4
    return pl.CostEstimate(
        flops=flops,
        transcendentals=b_rows * ad_pad,      # tanh on the padded output block
        bytes_accessed=bytes_in + bytes_out,
    )


@functools.partial(jax.jit, static_argnames=("action_dim", "tm", "small_batch"))
def actor_forward(state, params, action_dim, tm=512, small_batch=64):
    """state: (B, state_dim) float32. Returns (B, action_dim) float32."""
    w1, b1, w2, b2, w3, b3 = params
    B, sd = state.shape
    sd_pad = w1.shape[0]      # state_dim padded to 128
    ad_pad = w3.shape[1]      # action_dim padded to 128 (lane-dense output stores)

    x = state.astype(w1.dtype)
    if sd != sd_pad:
        x = jnp.pad(x, ((0, 0), (0, sd_pad - sd)))

    weights = (w1, b1, w2, b2, w3, b3)

    # ---------- tiny (acting) batches: single grid-free invocation ----------
    if B <= small_batch:
        B_pad = _round_up(B, SUBLANE)
        if B_pad != B:
            x = jnp.pad(x, ((0, B_pad - B), (0, 0)))
        out = pl.pallas_call(
            actor_kernel,
            out_shape=jax.ShapeDtypeStruct((B_pad, ad_pad), jnp.float32),
            cost_estimate=_cost_estimate(B_pad, sd_pad, ad_pad, (x,) + weights),
        )(x, *weights)
        return out[:B, :action_dim]

    # ---------- large (training) batches: tiled over the batch dim ----------
    B8 = _round_up(B, SUBLANE)
    # >= 2 grid steps so dual-TensorCore chips (v7x) shard across both cores;
    # tile size chosen so total batch padding is at most a few sublane rows.
    n_tiles = max(2, pl.cdiv(B8, tm))
    tm_eff = _round_up(pl.cdiv(B8, n_tiles), SUBLANE)
    B_pad = n_tiles * tm_eff
    if B_pad != B:
        x = jnp.pad(x, ((0, B_pad - B), (0, 0)))

    out = pl.pallas_call(
        actor_kernel,
        out_shape=jax.ShapeDtypeStruct((B_pad, ad_pad), jnp.float32),
        grid_spec=pltpu.PrefetchScalarGridSpec(
            num_scalar_prefetch=0,
            grid=(n_tiles,),
            in_specs=[
                # per-tile activation block (tm_eff, 128): fully aligned
                pl.BlockSpec((tm_eff, sd_pad), lambda i: (i, 0)),
                # weights / biases: constant index_map -> DMA'd once, VMEM-resident
                pl.BlockSpec((sd_pad, HIDDEN), lambda i: (0, 0)),
                pl.BlockSpec((1, HIDDEN), lambda i: (0, 0)),
                pl.BlockSpec((HIDDEN, HIDDEN), lambda i: (0, 0)),
                pl.BlockSpec((1, HIDDEN), lambda i: (0, 0)),
                pl.BlockSpec((HIDDEN, ad_pad), lambda i: (0, 0)),
                pl.BlockSpec((1, ad_pad), lambda i: (0, 0)),
            ],
            # lane-dense 128-wide output block -> unmasked stores
            out_specs=pl.BlockSpec((tm_eff, ad_pad), lambda i: (i, 0)),
        ),
        compiler_params=pltpu.CompilerParams(
            dimension_semantics=("parallel",),
        ),
        cost_estimate=_cost_estimate(B_pad, sd_pad, ad_pad, (x,) + weights),
    )(x, *weights)

    return out[:B, :action_dim]


def init_actor_params(key, state_dim, action_dim, dtype=jnp.float32):
    """PyTorch nn.Linear default init (U[-1/sqrt(fan_in), +1/sqrt(fan_in)]).

    Weights are stored as (in, out) and zero-padded so state_dim/action_dim are
    multiples of 128; the padding contributes exactly zero to the real outputs.
    Use dtype=jnp.bfloat16 on v6e/v7x for faster MXU + lighter DMA; biases stay
    f32 and accumulation is f32 either way.
    """
    keys = jax.random.split(key, 6)
    sd_pad = _round_up(state_dim, LANE)
    ad_pad = _round_up(action_dim, LANE)

    def linear(kw, kb, fan_in, fan_out, in_pad, out_pad):
        bound = 1.0 / jnp.sqrt(jnp.float32(fan_in))
        w = jax.random.uniform(kw, (fan_in, fan_out), jnp.float32, -bound, bound)
        b = jax.random.uniform(kb, (1, fan_out), jnp.float32, -bound, bound)
        w = jnp.pad(w, ((0, in_pad - fan_in), (0, out_pad - fan_out)))
        b = jnp.pad(b, ((0, 0), (0, out_pad - fan_out)))
        return w.astype(dtype), b  # bias stays float32

    w1, b1 = linear(keys[0], keys[1], state_dim, HIDDEN, sd_pad, HIDDEN)
    w2, b2 = linear(keys[2], keys[3], HIDDEN, HIDDEN, HIDDEN, HIDDEN)
    w3, b3 = linear(keys[4], keys[5], HIDDEN, action_dim, HIDDEN, ad_pad)
    return (w1, b1, w2, b2, w3, b3)


def actor_forward_ref(state, params, action_dim):
    """Pure-JAX reference on the (padded) parameters."""
    w1, b1, w2, b2, w3, b3 = params
    sd_pad = w1.shape[0]
    x = jnp.pad(state, ((0, 0), (0, sd_pad - state.shape[1]))).astype(jnp.float32)
    h1 = jnp.maximum(x @ w1.astype(jnp.float32) + b1, 0.0)
    h2 = jnp.maximum(h1 @ w2.astype(jnp.float32) + b2, 0.0)
    return jnp.tanh(h2 @ w3.astype(jnp.float32) + b3)[:, :action_dim]


if __name__ == "__main__":
    key = jax.random.PRNGKey(0)
    k_params, k_s1, k_s2 = jax.random.split(key, 3)

    state_dim = 16
    action_dim = 8
    params = init_actor_params(k_params, state_dim, action_dim)  # f32 weights

    # Small (acting) batch: grid-free single-block path.
    state_small = jax.random.normal(k_s1, (2, state_dim), jnp.float32)
    out_small = jax.block_until_ready(actor_forward(state_small, params, action_dim))
    ref_small = actor_forward_ref(state_small, params, action_dim)
    assert out_small.shape == (2, action_dim)
    assert jnp.allclose(out_small, ref_small, atol=1e-5, rtol=1e-5), "small-batch mismatch"

    # Large (training) batch: tiled path with >= 2 parallel grid steps.
    state_big = jax.random.normal(k_s2, (300, state_dim), jnp.float32)
    out_big = jax.block_until_ready(actor_forward(state_big, params, action_dim))
    ref_big = actor_forward_ref(state_big, params, action_dim)
    assert out_big.shape == (300, action_dim)
    assert jnp.allclose(out_big, ref_big, atol=1e-5, rtol=1e-5), "large-batch mismatch"

    print("KERNEL_OK")
</pallas_src>

<mosaic_0001>
module attributes {stable_mosaic.version = 11 : i64} {
  func.func @actor_kernel(%arg0: memref<8x128xf32, #tpu.memory_space<vmem>>, %arg1: memref<128x256xf32, #tpu.memory_space<vmem>>, %arg2: memref<1x256xf32, #tpu.memory_space<vmem>>, %arg3: memref<256x256xf32, #tpu.memory_space<vmem>>, %arg4: memref<1x256xf32, #tpu.memory_space<vmem>>, %arg5: memref<256x128xf32, #tpu.memory_space<vmem>>, %arg6: memref<1x128xf32, #tpu.memory_space<vmem>>, %arg7: memref<8x128xf32, #tpu.memory_space<vmem>>) attributes {dimension_semantics = [], scalar_prefetch = 0 : i64, scratch_operands = 0 : i64, tpu.core_type = #tpu.core_type<tc>} {
    %c0 = arith.constant 0 : index
    %c0_0 = arith.constant 0 : index
    %0 = vector.load %arg0[%c0, %c0_0] : memref<8x128xf32, #tpu.memory_space<vmem>>, vector<8x128xf32>
    %c0_1 = arith.constant 0 : index
    %c0_2 = arith.constant 0 : index
    %1 = vector.load %arg1[%c0_1, %c0_2] : memref<128x256xf32, #tpu.memory_space<vmem>>, vector<128x256xf32>
    %cst = arith.constant dense<0.000000e+00> : vector<8x256xf32>
    %2 = tpu.matmul %0, %1, %cst {dimension_numbers = #tpu.dot_dimension_numbers<[1], [0], [0], [1], [0, 0, 1, 1], [], []>} : vector<8x128xf32>, vector<128x256xf32>, vector<8x256xf32> -> vector<8x256xf32>
    %c0_3 = arith.constant 0 : index
    %c0_4 = arith.constant 0 : index
    %3 = vector.load %arg2[%c0_3, %c0_4] : memref<1x256xf32, #tpu.memory_space<vmem>>, vector<1x256xf32>
    %4 = vector.broadcast %3 : vector<1x256xf32> to vector<8x256xf32>
    %5 = arith.addf %2, %4 : vector<8x256xf32>
    %cst_5 = arith.constant 0.000000e+00 : f32
    %6 = vector.broadcast %cst_5 : f32 to vector<8x256xf32>
    %7 = arith.maximumf %5, %6 : vector<8x256xf32>
    %c0_6 = arith.constant 0 : index
    %c0_7 = arith.constant 0 : index
    %8 = vector.load %arg3[%c0_6, %c0_7] : memref<256x256xf32, #tpu.memory_space<vmem>>, vector<256x256xf32>
    %cst_8 = arith.constant dense<0.000000e+00> : vector<8x256xf32>
    %9 = tpu.matmul %7, %8, %cst_8 {dimension_numbers = #tpu.dot_dimension_numbers<[1], [0], [0], [1], [0, 0, 1, 1], [], []>} : vector<8x256xf32>, vector<256x256xf32>, vector<8x256xf32> -> vector<8x256xf32>
    %c0_9 = arith.constant 0 : index
    %c0_10 = arith.constant 0 : index
    %10 = vector.load %arg4[%c0_9, %c0_10] : memref<1x256xf32, #tpu.memory_space<vmem>>, vector<1x256xf32>
    %11 = vector.broadcast %10 : vector<1x256xf32> to vector<8x256xf32>
    %12 = arith.addf %9, %11 : vector<8x256xf32>
    %cst_11 = arith.constant 0.000000e+00 : f32
    %13 = vector.broadcast %cst_11 : f32 to vector<8x256xf32>
    %14 = arith.maximumf %12, %13 : vector<8x256xf32>
    %c0_12 = arith.constant 0 : index
    %c0_13 = arith.constant 0 : index
    %15 = vector.load %arg5[%c0_12, %c0_13] : memref<256x128xf32, #tpu.memory_space<vmem>>, vector<256x128xf32>
    %cst_14 = arith.constant dense<0.000000e+00> : vector<8x128xf32>
    %16 = tpu.matmul %14, %15, %cst_14 {dimension_numbers = #tpu.dot_dimension_numbers<[1], [0], [0], [1], [0, 0, 1, 1], [], []>} : vector<8x256xf32>, vector<256x128xf32>, vector<8x128xf32> -> vector<8x128xf32>
    %c0_15 = arith.constant 0 : index
    %c0_16 = arith.constant 0 : index
    %17 = vector.load %arg6[%c0_15, %c0_16] : memref<1x128xf32, #tpu.memory_space<vmem>>, vector<1x128xf32>
    %18 = vector.broadcast %17 : vector<1x128xf32> to vector<8x128xf32>
    %19 = arith.addf %16, %18 : vector<8x128xf32>
    %20 = math.tanh %19 : vector<8x128xf32>
    %c0_17 = arith.constant 0 : index
    %c0_18 = arith.constant 0 : index
    %21 = vector.load %arg7[%c0_17, %c0_18] : memref<8x128xf32, #tpu.memory_space<vmem>>, vector<8x128xf32>
    tpu.vector_store %arg7[%c0_17, %c0_18], %20 {strides = array<i32>} : memref<8x128xf32, #tpu.memory_space<vmem>>, vector<8x128xf32>,
    return
  }
}

</mosaic_0001>

<bundles_post_ra>
// kernel: actor_forward.1
= control target key start
LH: loop header
LB: loop body
LE: loop exit
PB: predicated region body
PF: predicated region fallthrough
CT: control target
= control target key end

     0   :  { %12 = vsyncpa [#allocation3], 0  ;;  %s801_s0 = inlined_call_operand.vmem [shape: f32[8,128], index: 0, kind: input, shape index: {}]   ;;  %s802_s1 = inlined_call_operand.hbm [shape: f32[128,256], index: 1, kind: input, shape index: {}]   ;;  %s803_s2 = inlined_call_operand.vmem [shape: f32[1,256], index: 2, kind: input, shape index: {}]   ;;  %s804_s3 = inlined_call_operand.hbm [shape: f32[256,256], index: 3, kind: input, shape index: {}]   ;;  %s805_s4 = inlined_call_operand.vmem [shape: f32[1,256], index: 4, kind: input, shape index: {}]   ;;  %s806_s5 = inlined_call_operand.hbm [shape: f32[256,128], index: 5, kind: input, shape index: {}]   ;;  %s807_s6 = inlined_call_operand.vmem [shape: f32[1,128], index: 6, kind: input, shape index: {}]   ;;  %s808_s7 = inlined_call_operand.vmem [shape: f32[8,128], index: 7, kind: output, shape index: {}]  }
   0x1   :  { %13 = vsyncpa [#allocation5], 0  ;;  %s695_s24 = smov [#allocation4]   ;;  %s696_s26 = smov [#allocation2]  }
   0x2   :  { %s35_s25 = sshll.u32 %s695_s24, 4  ;;  %s21_s27 = sshll.u32 %s696_s26, 4  ;;  %s36_s25 = int_to_ptr.vmem [resolvable:$true] %s35_s25  ;;  %s743_s27 = int_to_ptr.vmem [resolvable:$true] %s21_s27 }
   0x3   :  { %s625_s30 = scalar_lea.hbm %s804_s3, 8192 }
   0x4   :  { %p626_p0 = scmp.ne.s32.totalorder %s804_s3, %s625_s30  ;;  %p629_p1 = scmp.lt.u32.totalorder %s625_s30, %s804_s3 }
   0x6   :  { %p631_p2 = pnand %p629_p1, %p626_p0 }
   0x8   :  { %634 = shalt.err (!%p631_p2)
}
   0x9   :  { %s635_s12 = scalar_lea.vmem %s36_s25, 8192  ;;  %p640_p4 = scmp.lt.s32.totalorder %s36_s25, %s36_s25 }
   0xa   :  { %p636_p3 = scmp.ne.s32.totalorder %s36_s25, %s635_s12  ;;  %p641_p5 = scmp.lt.s32.totalorder %s635_s12, %s635_s12 }
   0xc   :  { %p642_p6 = por %p641_p5, %p640_p4 }
   0xe   :  { %p643_p7 = pnand %p642_p6, %p636_p3 }
  0x10   :  { %646 = shalt.err (!%p643_p7)
}
  0x11   :  { %s697_s13 = smov 256   ;;  %s698_s14 = smov 16  }
  0x12   :  { %41 = dma.hbm_to_vmem [thread:$0]  %s804_s3, 8192, %s36_s25, [#allocation5], %s697_s13, %s697_s13, %s698_s14  }
  0x13   :  { %s647_s19 = scalar_lea.hbm %s802_s1, 4096 }
  0x14   :  { %p648_p8 = scmp.ne.s32.totalorder %s802_s1, %s647_s19  ;;  %p651_p9 = scmp.lt.u32.totalorder %s647_s19, %s802_s1 }
  0x16   :  { %p653_p10 = pnand %p651_p9, %p648_p8 }
  0x18   :  { %656 = shalt.err (!%p653_p10)
}
  0x19   :  { %s657_s24 = scalar_lea.vmem %s743_s27, 4096  ;;  %p662_p12 = scmp.lt.s32.totalorder %s743_s27, %s743_s27 }
  0x1a   :  { %p658_p11 = scmp.ne.s32.totalorder %s743_s27, %s657_s24  ;;  %p663_p13 = scmp.lt.s32.totalorder %s657_s24, %s657_s24 }
  0x1c   :  { %p664_p0 = por %p663_p13, %p662_p12 }
  0x1e   :  { %p665_p1 = pnand %p664_p0, %p658_p11 }
  0x20   :  { %668 = shalt.err (!%p665_p1)
}
  0x21   :  { %27 = dma.hbm_to_vmem [thread:$0]  %s802_s1, 4096, %s743_s27, [#allocation3], %s697_s13, %s697_s13, %s698_s14  }
  0x22   :  { %s699_s26 = smov [#allocation6]   ;;  %s669_s8 = scalar_lea.hbm %s806_s5, 4096 }
  0x23   :  { %s49_s28 = sshll.u32 %s699_s26, 4  ;;  %p670_p2 = scmp.ne.s32.totalorder %s806_s5, %s669_s8  ;;  %s50_s28 = int_to_ptr.vmem [resolvable:$true] %s49_s28 }
  0x24   :  { %p673_p3 = scmp.lt.u32.totalorder %s669_s8, %s806_s5 }
  0x26   :  { %p675_p4 = pnand %p673_p3, %p670_p2 }
  0x28   :  { %678 = shalt.err (!%p675_p4)
}
  0x29   :  { %s679_s15 = scalar_lea.vmem %s50_s28, 4096  ;;  %p684_p6 = scmp.lt.s32.totalorder %s50_s28, %s50_s28 }
  0x2a   :  { %p680_p5 = scmp.ne.s32.totalorder %s50_s28, %s679_s15  ;;  %p685_p7 = scmp.lt.s32.totalorder %s679_s15, %s679_s15 }
  0x2c   :  { %p686_p8 = por %p685_p7, %p684_p6 }
  0x2e   :  { %p687_p9 = pnand %p686_p8, %p680_p5 }
  0x30   :  { %690 = shalt.err (!%p687_p9)
}
  0x31   :  { %s700_s1 = smov 128   ;;  %s701_s27 = smov 8  }
  0x32   :  { %55 = dma.hbm_to_vmem [thread:$0]  %s806_s5, 4096, %s50_s28, [#allocation5], %s700_s1, %s700_s1, %s701_s27  }
  0x33   :  { %691 = dma.done.wait [#allocation3], 4096  }
  0x34   :  { %692 = vsyncadd [#allocation3], 4294963200 }
  0x35   :  { %693 = dma.done.wait [#allocation5], 12288  }
  0x36   :  { %694 = vsyncadd [#allocation5], 4294955008  ;;  %v702_v0 = vmov 0.0   ;;  %v69_v1 = vld [vmem:[#allocation2 + $0x8] sm:$0xff]  ;;  %v71_v2 = vld [vmem:[#allocation2 + $0x18] sm:$0xff] }
  0x37   :  { %176 = vmatprep.mubr.f32.mxu0 %v702_v0  ;;  %v68_v3 = vld [vmem:[#allocation2] sm:$0xff]  ;;  %v487_v4 = vpack.c.bf16 %v71_v2, %v69_v1  ;;  %v70_v5 = vld [vmem:[#allocation2 + $0x10] sm:$0xff]  ;;  %v73_v6 = vld [vmem:[#allocation2 + $0x28] sm:$0xff] }
  0x38   :  { %v75_v7 = vld [vmem:[#allocation2 + $0x38] sm:$0xff]  ;;  %v489_v8 = vpack.c.bf16 %v70_v5, %v68_v3  ;;  %v72_v10 = vld [vmem:[#allocation2 + $0x20] sm:$0xff]  ;;  %v74_v11 = vld [vmem:[#allocation2 + $0x30] sm:$0xff] }
  0x39   :  { %v491_v9 = vpack.c.bf16 %v75_v7, %v73_v6  ;;  %v77_v12 = vld [vmem:[#allocation2 + $0x48] sm:$0xff]  ;;  %488 = vmatprep.subr.bf16.mxu0 %v487_v4  ;;  %v79_v13 = vld [vmem:[#allocation2 + $0x58] sm:$0xff]  ;;  %v493_v14 = vpack.c.bf16 %v74_v11, %v72_v10  ;;  %v76_v16 = vld [vmem:[#allocation2 + $0x40] sm:$0xff] }
  0x3a   :  { %490 = vmatpush1.bf16.msra.mxu0 %v489_v8  ;;  %v495_v15 = vpack.c.bf16 %v79_v13, %v77_v12  ;;  %v78_v17 = vld [vmem:[#allocation2 + $0x50] sm:$0xff]  ;;  %v81_v18 = vld [vmem:[#allocation2 + $0x68] sm:$0xff]  ;;  %v83_v19 = vld [vmem:[#allocation2 + $0x78] sm:$0xff] }
  0x3b   :  { %492 = vmatprep.subr.bf16.mxu0 %v491_v9  ;;  %v497_v20 = vpack.c.bf16 %v78_v17, %v76_v16  ;;  %v499_v21 = vpack.c.bf16 %v83_v19, %v81_v18  ;;  %v80_v22 = vld [vmem:[#allocation2 + $0x60] sm:$0xff]  ;;  %v82_v23 = vld [vmem:[#allocation2 + $0x70] sm:$0xff]  ;;  %v85_v24 = vld [vmem:[#allocation2 + $0x88] sm:$0xff] }
  0x3c   :  { %v87_v25 = vld [vmem:[#allocation2 + $0x98] sm:$0xff]  ;;  %v84_v26 = vld [vmem:[#allocation2 + $0x80] sm:$0xff]  ;;  %v86_v27 = vld [vmem:[#allocation2 + $0x90] sm:$0xff]  ;;  %v501_v31 = vpack.c.bf16 %v82_v23, %v80_v22 }
  0x3d   :  { %v186_v28 = vld [vmem:[#allocation4 + $0x8] sm:$0xff]  ;;  %v188_v29 = vld [vmem:[#allocation4 + $0x18] sm:$0xff]  ;;  %v185_v30 = vld [vmem:[#allocation4] sm:$0xff]  ;;  %v503_v36 = vpack.c.bf16 %v87_v25, %v85_v24  ;;  %v505_v46 = vpack.c.bf16 %v86_v27, %v84_v26 }
  0x3e   :  { %494 = vmatpush1.bf16.msra.mxu0 %v493_v14  ;;  %v519_v32 = vpack.c.bf16 %v188_v29, %v186_v28  ;;  %v187_v33 = vld [vmem:[#allocation4 + $0x10] sm:$0xff]  ;;  %v190_v34 = vld [vmem:[#allocation4 + $0x28] sm:$0xff]  ;;  %v192_v35 = vld [vmem:[#allocation4 + $0x38] sm:$0xff] }
  0x3f   :  { %496 = vmatprep.subr.bf16.mxu0 %v495_v15  ;;  %v521_v37 = vpack.c.bf16 %v187_v33, %v185_v30  ;;  %v523_v38 = vpack.c.bf16 %v192_v35, %v190_v34  ;;  %v189_v39 = vld [vmem:[#allocation4 + $0x20] sm:$0xff]  ;;  %v191_v40 = vld [vmem:[#allocation4 + $0x30] sm:$0xff]  ;;  %v194_v41 = vld [vmem:[#allocation4 + $0x48] sm:$0xff] }
  0x40   :  { %v89_v42 = vld [vmem:[#allocation2 + $0xa8] sm:$0xff]  ;;  %v91_v43 = vld [vmem:[#allocation2 + $0xb8] sm:$0xff]  ;;  %520 = vmatprep.subr.bf16.mxu1 %v519_v32  ;;  %v525_v45 = vpack.c.bf16 %v191_v40, %v189_v39  ;;  %v88_v47 = vld [vmem:[#allocation2 + $0xa0] sm:$0xff] }
  0x41   :  { %v196_v44 = vld [vmem:[#allocation4 + $0x58] sm:$0xff]  ;;  %522 = vmatpush1.bf16.msra.mxu1 %v521_v37  ;;  %v193_v49 = vld [vmem:[#allocation4 + $0x40] sm:$0xff]  ;;  %v195_v50 = vld [vmem:[#allocation4 + $0x50] sm:$0xff]  ;;  %v507_v51 = vpack.c.bf16 %v91_v43, %v89_v42 }
  0x42   :  { %498 = vmatpush1.bf16.msra.mxu0 %v497_v20  ;;  %524 = vmatprep.subr.bf16.mxu1 %v523_v38  ;;  %v527_v48 = vpack.c.bf16 %v196_v44, %v194_v41  ;;  %v90_v52 = vld [vmem:[#allocation2 + $0xb0] sm:$0xff]  ;;  %v198_v53 = vld [vmem:[#allocation4 + $0x68] sm:$0xff]  ;;  %v200_v54 = vld [vmem:[#allocation4 + $0x78] sm:$0xff]  ;;  %v529_v57 = vpack.c.bf16 %v195_v50, %v193_v49 }
  0x43   :  { %500 = vmatprep.subr.bf16.mxu0 %v499_v21  ;;  %v93_v55 = vld [vmem:[#allocation2 + $0xc8] sm:$0xff]  ;;  %v95_v56 = vld [vmem:[#allocation2 + $0xd8] sm:$0xff]  ;;  %v509_v58 = vpack.c.bf16 %v90_v52, %v88_v47  ;;  %v92_v59 = vld [vmem:[#allocation2 + $0xc0] sm:$0xff]  ;;  %v531_v60 = vpack.c.bf16 %v200_v54, %v198_v53 }
  0x44   :  { %v197_v61 = vld [vmem:[#allocation4 + $0x60] sm:$0xff]  ;;  %v199_v62 = vld [vmem:[#allocation4 + $0x70] sm:$0xff]  ;;  %v511_v63 = vpack.c.bf16 %v95_v56, %v93_v55  ;;  %v202_v1 = vld [vmem:[#allocation4 + $0x88] sm:$0xff] }
  0x45   :  { %526 = vmatpush1.bf16.msra.mxu1 %v525_v45  ;;  %v94_v0 = vld [vmem:[#allocation2 + $0xd0] sm:$0xff]  ;;  %v204_v2 = vld [vmem:[#allocation4 + $0x98] sm:$0xff]  ;;  %v97_v3 = vld [vmem:[#allocation2 + $0xe8] sm:$0xff]  ;;  %v533_v5 = vpack.c.bf16 %v199_v62, %v197_v61 }
  0x46   :  { %502 = vmatpush1.bf16.msra.mxu0 %v501_v31  ;;  %528 = vmatprep.subr.bf16.mxu1 %v527_v48  ;;  %v99_v4 = vld [vmem:[#allocation2 + $0xf8] sm:$0xff]  ;;  %v513_v6 = vpack.c.bf16 %v94_v0, %v92_v59  ;;  %v96_v7 = vld [vmem:[#allocation2 + $0xe0] sm:$0xff]  ;;  %v535_v8 = vpack.c.bf16 %v204_v2, %v202_v1  ;;  %v203_v10 = vld [vmem:[#allocation4 + $0x90] sm:$0xff] }
  0x47   :  { %504 = vmatprep.subr.bf16.mxu0 %v503_v36  ;;  %v201_v9 = vld [vmem:[#allocation4 + $0x80] sm:$0xff]  ;;  %v515_v11 = vpack.c.bf16 %v99_v4, %v97_v3  ;;  %v98_v12 = vld [vmem:[#allocation2 + $0xf0] sm:$0xff]  ;;  %v206_v13 = vld [vmem:[#allocation4 + $0xa8] sm:$0xff] }
  0x48   :  { %v208_v14 = vld [vmem:[#allocation4 + $0xb8] sm:$0xff]  ;;  %v537_v15 = vpack.c.bf16 %v203_v10, %v201_v9  ;;  %v517_v16 = vpack.c.bf16 %v98_v12, %v96_v7  ;;  %v205_v18 = vld [vmem:[#allocation4 + $0xa0] sm:$0xff]  ;;  %v207_v19 = vld [vmem:[#allocation4 + $0xb0] sm:$0xff] }
  0x49   :  { %530 = vmatpush1.bf16.msra.mxu1 %v529_v57  ;;  %v539_v17 = vpack.c.bf16 %v208_v14, %v206_v13  ;;  %v210_v20 = vld [vmem:[#allocation4 + $0xc8] sm:$0xff]  ;;  %v212_v21 = vld [vmem:[#allocation4 + $0xd8] sm:$0xff]  ;;  %v541_v22 = vpack.c.bf16 %v207_v19, %v205_v18  ;;  %v67_v23 = vld [vmem:[%s801_s0] sm:$0xff] }
  0x4a   :  { %506 = vmatpush1.bf16.msra.mxu0 %v505_v46  ;;  %532 = vmatprep.subr.bf16.mxu1 %v531_v60  ;;  %v543_v24 = vpack.c.bf16 %v212_v21, %v210_v20  ;;  %v209_v25 = vld [vmem:[#allocation4 + $0xc0] sm:$0xff]  ;;  %v211_v26 = vld [vmem:[#allocation4 + $0xd0] sm:$0xff]  ;;  %v214_v27 = vld [vmem:[#allocation4 + $0xe8] sm:$0xff] }
  0x4b   :  { %508 = vmatprep.subr.bf16.mxu0 %v507_v51  ;;  %v216_v28 = vld [vmem:[#allocation4 + $0xf8] sm:$0xff]  ;;  %v545_v29 = vpack.c.bf16 %v211_v26, %v209_v25  ;;  %v213_v31 = vld [vmem:[#allocation4 + $0xe0] sm:$0xff]  ;;  %v215_v32 = vld [vmem:[#allocation4 + $0xf0] sm:$0xff] }
  0x4c   :  { %v547_v30 = vpack.c.bf16 %v216_v28, %v214_v27  ;;  %v218_v33 = vld [vmem:[#allocation4 + $0x108] sm:$0xff]  ;;  %v220_v34 = vld [vmem:[#allocation4 + $0x118] sm:$0xff]  ;;  %v549_v35 = vpack.c.bf16 %v215_v32, %v213_v31  ;;  %v217_v37 = vld [vmem:[#allocation4 + $0x100] sm:$0xff] }
  0x4d   :  { %534 = vmatpush1.bf16.msra.mxu1 %v533_v5  ;;  %v551_v36 = vpack.c.bf16 %v220_v34, %v218_v33  ;;  %v219_v38 = vld [vmem:[#allocation4 + $0x110] sm:$0xff]  ;;  %v222_v39 = vld [vmem:[#allocation4 + $0x128] sm:$0xff]  ;;  %v224_v40 = vld [vmem:[#allocation4 + $0x138] sm:$0xff] }
  0x4e   :  { %510 = vmatpush1.bf16.msra.mxu0 %v509_v58  ;;  %536 = vmatprep.subr.bf16.mxu1 %v535_v8  ;;  %v553_v41 = vpack.c.bf16 %v219_v38, %v217_v37  ;;  %v555_v42 = vpack.c.bf16 %v224_v40, %v222_v39  ;;  %v221_v43 = vld [vmem:[#allocation4 + $0x120] sm:$0xff]  ;;  %v223_v44 = vld [vmem:[#allocation4 + $0x130] sm:$0xff]  ;;  %v226_v45 = vld [vmem:[#allocation4 + $0x148] sm:$0xff] }
  0x4f   :  { %512 = vmatprep.subr.bf16.mxu0 %v511_v63  ;;  %v228_v46 = vld [vmem:[#allocation4 + $0x158] sm:$0xff]  ;;  %v557_v47 = vpack.c.bf16 %v223_v44, %v221_v43  ;;  %v225_v49 = vld [vmem:[#allocation4 + $0x140] sm:$0xff]  ;;  %v227_v50 = vld [vmem:[#allocation4 + $0x150] sm:$0xff] }
  0x50   :  { %v559_v48 = vpack.c.bf16 %v228_v46, %v226_v45  ;;  %v230_v51 = vld [vmem:[#allocation4 + $0x168] sm:$0xff]  ;;  %v232_v52 = vld [vmem:[#allocation4 + $0x178] sm:$0xff]  ;;  %v561_v53 = vpack.c.bf16 %v227_v50, %v225_v49  ;;  %v229_v55 = vld [vmem:[#allocation4 + $0x160] sm:$0xff] }
  0x51   :  { %538 = vmatpush1.bf16.msra.mxu1 %v537_v15  ;;  %v563_v54 = vpack.c.bf16 %v232_v52, %v230_v51  ;;  %v231_v56 = vld [vmem:[#allocation4 + $0x170] sm:$0xff]  ;;  %v234_v57 = vld [vmem:[#allocation4 + $0x188] sm:$0xff]  ;;  %v236_v58 = vld [vmem:[#allocation4 + $0x198] sm:$0xff] }
  0x52   :  { %514 = vmatpush1.bf16.msra.mxu0 %v513_v6  ;;  %540 = vmatprep.subr.bf16.mxu1 %v539_v17  ;;  %v565_v59 = vpack.c.bf16 %v231_v56, %v229_v55  ;;  %v567_v60 = vpack.c.bf16 %v236_v58, %v234_v57  ;;  %v233_v61 = vld [vmem:[#allocation4 + $0x180] sm:$0xff]  ;;  %v235_v62 = vld [vmem:[#allocation4 + $0x190] sm:$0xff]  ;;  %v238_v63 = vld [vmem:[#allocation4 + $0x1a8] sm:$0xff]  ;;  %v102_v57 = vlaneseq }
  0x53   :  { %516 = vmatprep.subr.bf16.mxu0 %v515_v11  ;;  %v240_v0 = vld [vmem:[#allocation4 + $0x1b8] sm:$0xff]  ;;  %v569_v1 = vpack.c.bf16 %v235_v62, %v233_v61  ;;  %v237_v3 = vld [vmem:[#allocation4 + $0x1a0] sm:$0xff]  ;;  %v239_v4 = vld [vmem:[#allocation4 + $0x1b0] sm:$0xff] }
  0x54   :  { %v571_v2 = vpack.c.bf16 %v240_v0, %v238_v63  ;;  %v242_v5 = vld [vmem:[#allocation4 + $0x1c8] sm:$0xff]  ;;  %v244_v6 = vld [vmem:[#allocation4 + $0x1d8] sm:$0xff]  ;;  %v573_v7 = vpack.c.bf16 %v239_v4, %v237_v3  ;;  %v241_v9 = vld [vmem:[#allocation4 + $0x1c0] sm:$0xff]  ;;  %v103_v58 = vshrl.u32 %v102_v57, 7 }
  0x55   :  { %542 = vmatpush1.bf16.msra.mxu1 %v541_v22  ;;  %v575_v8 = vpack.c.bf16 %v244_v6, %v242_v5  ;;  %v243_v10 = vld [vmem:[#allocation4 + $0x1d0] sm:$0xff]  ;;  %v246_v12 = vld [vmem:[#allocation4 + $0x1e8] sm:$0xff]  ;;  %v248_v13 = vld [vmem:[#allocation4 + $0x1f8] sm:$0xff] }
  0x56   :  { %518 = vmatpush1.bf16.msra.mxu0 %v517_v16  ;;  %544 = vmatprep.subr.bf16.mxu1 %v543_v24  ;;  %v577_v11 = vpack.c.bf16 %v243_v10, %v241_v9  ;;  %v579_v14 = vpack.c.bf16 %v248_v13, %v246_v12  ;;  %v245_v15 = vld [vmem:[#allocation4 + $0x1e0] sm:$0xff]  ;;  %v247_v16 = vld [vmem:[#allocation4 + $0x1f0] sm:$0xff]  ;;  %v351_v19 = vld [vmem:[#allocation6 + $0x88] sm:$0xff]  ;;  %v108_v61 = vsub.s32 1, %v103_v58 }
  0x57   :  { %v581_v17 = vpack.c.bf16 %v247_v16, %v245_v15  ;;  %v350_v18 = vld [vmem:[#allocation6 + $0x80] sm:$0xff]  ;;  %v335_v22 = vld [vmem:[#allocation6 + $0x8] sm:$0xff]  ;;  %v353_v24 = vld [vmem:[#allocation6 + $0x98] sm:$0xff] }
  0x58   :  { %v334_v20 = vld [vmem:[#allocation6] sm:$0xff]  ;;  %v583_v21 = vpack.c.bf16 %v351_v19, %v350_v18  ;;  %v336_v27 = vld [vmem:[#allocation6 + $0x10] sm:$0xff]  ;;  %v337_v28 = vld [vmem:[#allocation6 + $0x18] sm:$0xff] }
  0x59   :  { %177 = vmatmul.mubr.f32.vlgmr.msra.gmra.mrb[0].mxu0 %v67_v23  ;;  %546 = vmatpush1.bf16.msra.mxu1 %v545_v29  ;;  %v352_v23 = vld [vmem:[#allocation6 + $0x90] sm:$0xff]  ;;  %v585_v25 = vpack.c.bf16 %v335_v22, %v334_v20  ;;  %v354_v29 = vld [vmem:[#allocation6 + $0xa0] sm:$0xff]  ;;  %v589_v31 = vpack.c.bf16 %v337_v28, %v336_v27  ;;  %v339_v34 = vld [vmem:[#allocation6 + $0x28] sm:$0xff] }
  0x5a   :  { %548 = vmatprep.subr.bf16.mxu1 %v547_v30  ;;  %v587_v26 = vpack.c.bf16 %v353_v24, %v352_v23  ;;  %584 = vmatprep.subr.bf16.mxu0 %v583_v21  ;;  %v355_v30 = vld [vmem:[#allocation6 + $0xa8] sm:$0xff]  ;;  %v338_v33 = vld [vmem:[#allocation6 + $0x20] sm:$0xff]  ;;  %v340_v39 = vld [vmem:[#allocation6 + $0x30] sm:$0xff] }
  0x5b   :  { %586 = vmatpush3.bf16.msra.mxu0 %v585_v25  ;;  %v591_v32 = vpack.c.bf16 %v355_v30, %v354_v29  ;;  %v593_v37 = vpack.c.bf16 %v339_v34, %v338_v33  ;;  %v341_v40 = vld [vmem:[#allocation6 + $0x38] sm:$0xff]  ;;  %v342_v45 = vld [vmem:[#allocation6 + $0x40] sm:$0xff]  ;;  %v343_v46 = vld [vmem:[#allocation6 + $0x48] sm:$0xff] }
  0x5c   :  { %588 = vmatprep.subr.bf16.mxu0 %v587_v26  ;;  %v597_v43 = vpack.c.bf16 %v341_v40, %v340_v39  ;;  %v601_v49 = vpack.c.bf16 %v343_v46, %v342_v45  ;;  %v344_v51 = vld [vmem:[#allocation6 + $0x50] sm:$0xff]  ;;  %v345_v52 = vld [vmem:[#allocation6 + $0x58] sm:$0xff]  ;;  %v346_v6 = vld [vmem:[#allocation6 + $0x60] sm:$0xff] }
  0x5d   :  { %550 = vmatpush1.bf16.msra.mxu1 %v549_v35  ;;  %v356_v35 = vld [vmem:[#allocation6 + $0xb0] sm:$0xff]  ;;  %v605_v55 = vpack.c.bf16 %v345_v52, %v344_v51  ;;  %v365_v10 = vld [vmem:[#allocation6 + $0xf8] sm:$0xff]  ;;  %v249_v15 = vld [vmem:[%s805_s4] sm:$0x3] }
  0x5e   :  { %552 = vmatprep.subr.bf16.mxu1 %v551_v36  ;;  %v357_v36 = vld [vmem:[#allocation6 + $0xb8] sm:$0xff]  ;;  %v364_v9 = vld [vmem:[#allocation6 + $0xf0] sm:$0xff]  ;;  %v451_v25 = vld [vmem:[%s807_s6] ss:$0 sm:$0xff] }
  0x5f   :  { %590 = vmatpush3.bf16.msra.mxu0 %v589_v31  ;;  %v595_v38 = vpack.c.bf16 %v357_v36, %v356_v35  ;;  %v348_v12 = vld [vmem:[#allocation6 + $0x70] sm:$0xff]  ;;  %v349_v13 = vld [vmem:[#allocation6 + $0x78] sm:$0xff] }
  0x60   :  { %592 = vmatprep.subr.bf16.mxu0 %v591_v32 }
  0x61   :  { %554 = vmatpush1.bf16.msra.mxu1 %v553_v41  ;;  %v358_v41 = vld [vmem:[#allocation6 + $0xc0] sm:$0xff] }
  0x62   :  { %556 = vmatprep.subr.bf16.mxu1 %v555_v42  ;;  %v359_v42 = vld [vmem:[#allocation6 + $0xc8] sm:$0xff] }
  0x63   :  { %594 = vmatpush3.bf16.msra.mxu0 %v593_v37  ;;  %v599_v44 = vpack.c.bf16 %v359_v42, %v358_v41 }
  0x64   :  { %596 = vmatprep.subr.bf16.mxu0 %v595_v38 }
  0x65   :  { %558 = vmatpush1.bf16.msra.mxu1 %v557_v47  ;;  %v360_v47 = vld [vmem:[#allocation6 + $0xd0] sm:$0xff] }
  0x66   :  { %560 = vmatprep.subr.bf16.mxu1 %v559_v48  ;;  %v361_v48 = vld [vmem:[#allocation6 + $0xd8] sm:$0xff] }
  0x67   :  { %598 = vmatpush3.bf16.msra.mxu0 %v597_v43  ;;  %v603_v50 = vpack.c.bf16 %v361_v48, %v360_v47 }
  0x68   :  { %600 = vmatprep.subr.bf16.mxu0 %v599_v44 }
  0x69   :  { %562 = vmatpush1.bf16.msra.mxu1 %v561_v53  ;;  %v362_v53 = vld [vmem:[#allocation6 + $0xe0] sm:$0xff] }
  0x6a   :  { %564 = vmatprep.subr.bf16.mxu1 %v563_v54  ;;  %v363_v54 = vld [vmem:[#allocation6 + $0xe8] sm:$0xff] }
  0x6b   :  { %602 = vmatpush3.bf16.msra.mxu0 %v601_v49  ;;  %v607_v56 = vpack.c.bf16 %v363_v54, %v362_v53 }
  0x6c   :  { %604 = vmatprep.subr.bf16.mxu0 %v603_v50 }
  0x6d   :  { %566 = vmatpush1.bf16.msra.mxu1 %v565_v59  ;;  %v104_v59 = vsub.s32 0, %v103_v58 }
  0x6e   :  { %568 = vmatprep.subr.bf16.mxu1 %v567_v60  ;;  %v100_v60 = vld [vmem:[%s803_s2] sm:$0x3] }
  0x6f   :  { %606 = vmatpush3.bf16.msra.mxu0 %v605_v55  ;;  %v105_v62 = vrot.slane %v100_v60, %v104_v59  ;;  %v109_v63 = vrot.slane %v100_v60, %v108_v61  ;;  %v254_v16 = vrot.slane %v249_v15, %v104_v59 }
  0x70   :  { %608 = vmatprep.subr.bf16.mxu0 %v607_v56 }
  0x71   :  { %570 = vmatpush1.bf16.msra.mxu1 %v569_v1 }
  0x72   :  { %572 = vmatprep.subr.bf16.mxu1 %v571_v2 }
  0x75   :  { %574 = vmatpush1.bf16.msra.mxu1 %v573_v7  ;;  %v347_v7 = vld [vmem:[#allocation6 + $0x68] sm:$0xff] }
  0x76   :  { %576 = vmatprep.subr.bf16.mxu1 %v575_v8  ;;  %v609_v8 = vpack.c.bf16 %v347_v7, %v346_v6 }
  0x78   :  { %610 = vmatpush3.bf16.msra.mxu0 %v609_v8 }
  0x79   :  { %578 = vmatpush1.bf16.msra.mxu1 %v577_v11  ;;  %v611_v11 = vpack.c.bf16 %v365_v10, %v364_v9 }
  0x7a   :  { %580 = vmatprep.subr.bf16.mxu1 %v579_v14  ;;  %v613_v14 = vpack.c.bf16 %v349_v13, %v348_v12 }
  0x7b   :  { %612 = vmatprep.subr.bf16.mxu0 %v611_v11 }
  0x7c   :  { %614 = vmatpush3.bf16.msra.mxu0 %v613_v14 }
  0x7d   :  { %582 = vmatpush1.bf16.msra.mxu1 %v581_v17  ;;  %v258_v17 = vrot.slane %v249_v15, %v108_v61 }
 0x12c   :  { %v178_v0 = vpop.f32.mrb[0].mxu0 }
 0x12d   :  { %v179_v1 = vadd.f32 %v178_v0, %v105_v62  ;;  %v180_v2 = vpop.f32.mrb[1].mxu0 }
 0x12e   :  { %v181_v3 = vadd.f32 %v180_v2, %v109_v63 }
 0x12f   :  { %v183_v5 = vmax.f32 %v179_v1, 0.0 }
 0x130   :  { %v184_v4 = vmax.f32 %v181_v3, 0.0 }
 0x132   :  { %325 = vmatprep.mubr.f32.mxu1 %v184_v4 }
 0x133   :  { %326 = vmatmul.mubr.f32.vlgmr.msra.gmra.mrb[0].mxu1 %v183_v5 }
 0x206   :  { %v327_v18 = vpop.f32.mrb[0].mxu1 }
 0x207   :  { %v328_v19 = vadd.f32 %v327_v18, %v254_v16  ;;  %v329_v20 = vpop.f32.mrb[1].mxu1 }
 0x208   :  { %v330_v21 = vadd.f32 %v329_v20, %v258_v17 }
 0x209   :  { %v332_v23 = vmax.f32 %v328_v19, 0.0 }
 0x20a   :  { %v333_v22 = vmax.f32 %v330_v21, 0.0 }
 0x20c   :  { %437 = vmatprep.mubr.f32.mxu0 %v333_v22 }
 0x20d   :  { %438 = vmatmul.mubr.f32.vlgmr.msra.gmra.mrb[2].mxu0 %v332_v23 }
 0x2e0   :  { %v484_v24 = vpop.f32.mrb[2].mxu0 }
 0x2e1   :  { %v485_v26 = vpop.f32.mrb[3].mxu0 }
 0x2e2   :  { %v486_v27 = vadd.f32 %v485_v26, %v484_v24 }
 0x2e4   :  { %v440_v28 = vadd.f32 %v486_v27, %v451_v25 }
 0x2e6   :  { %623 = vtanh.f32 %v440_v28 }
 0x2f0   :  { %v624_v29 = vpop.eup %623 }
 0x2f1   :  { %444 = vst [vmem:[%s808_s7] sm:$0xff] %v624_v29 }
 0x2f2   :  { %449 = vsyncpa [#allocation3], 1 }
 0x2f3   :  { %450 = vsyncpa [#allocation5], 1 }

</bundles_post_ra>
